<compile_context>
chip_gen: v7x
topology: tpu7x:2x2x1
jax: 0.10.0
libtpu: 0.0.40
codegen_flags: <defaults>
</compile_context>

<pallas_src>
import jax
import jax.numpy as jnp
from jax.experimental import pallas as pl
from jax.experimental.pallas import tpu as pltpu


F_PAD = 128          # lane-dense feature width (padded with exact zeros)
_NEG_SLOPE = 0.2     # LeakyReLU slope from the reference
_PAD_FILL = -1e30    # fill for *padded* key columns only -> exp underflows to 0


# ----------------------------- helpers ---------------------------------------

def _round_up(x, m):
    return ((x + m - 1) // m) * m


def _tpu_vmem_capacity_bytes():
    try:
        return int(pltpu.get_tpu_info().vmem_capacity_bytes)
    except Exception:
        return 128 * 1024 * 1024      # conservative default (v5e/v6e)


def _pick_tiles(n):
    """Row-tile size TQ and padded node count Np (Np % TQ == 0, TQ % 8 == 0)."""
    n8 = _round_up(max(n, 8), 8)
    # Smaller row tiles on v7x (64 MiB VMEM) than on v5e/v6e (128 MiB).
    tq_cap = 512 if _tpu_vmem_capacity_bytes() >= (96 << 20) else 256
    if n8 <= tq_cap:
        return n8, n8
    return tq_cap, _round_up(n, tq_cap)


def _vmem_limit_bytes(tq, np_, f):
    """Scoped-VMEM request from the actual operand + temp footprint (+headroom)."""
    stream = 2 * (tq * np_ * 2        # bf16 mask tile, double buffered
                  + tq * 4            # src tile
                  + tq * f * 4)       # output tile
    resident = 2 * (2 * np_ * 4       # dst-score + pad-fill rows
                    + np_ * f * 4     # Wh
                    + f * f * 4       # fused-linear weight
                    + f * 4)          # bias
    temps = 4 * tq * np_ * 4          # ~4 live (TQ, Np) f32 softmax temporaries
    need = stream + resident + temps
    hard_cap = (100 << 20) if _tpu_vmem_capacity_bytes() >= (96 << 20) else (48 << 20)
    return int(min(hard_cap, max(32 << 20, 2 * need)))


# ----------------------------- Pallas kernels --------------------------------

def _attention_rows(mask_tile, src_tile, dst_row, fill_row):
    """Masked softmax rows for one (TQ, Np) tile — minimal materialized temps."""
    e = src_tile + dst_row                                   # (TQ, Np)
    # Fused: mask select + leaky_relu + pad fill in one elementwise pass.
    # Real non-neighbour columns get a literal 0 (reference keeps zeros in the
    # softmax); padded key columns get -1e30 so exp() underflows to exactly 0.
    e = jnp.where(mask_tile > 0,
                  jnp.where(e >= 0.0, e, _NEG_SLOPE * e),
                  fill_row)
    e = e - jnp.max(e, axis=1, keepdims=True)
    p = jnp.exp(e)
    s = jnp.sum(p, axis=1, keepdims=True)
    r = pl.reciprocal(s, approx=True)       # EUP slot (essentially free)
    r = r * (2.0 - s * r)                   # one Newton step -> ~exact, (TQ,1) only
    return p * r


def _gat_layer_kernel(mask_ref, src_ref, dstfill_ref, wh_ref, out_ref):
    att = _attention_rows(mask_ref[...], src_ref[...],
                          dstfill_ref[0:1, :], dstfill_ref[1:2, :])
    out_ref[...] = jnp.maximum(
        jnp.dot(att, wh_ref[...], preferred_element_type=jnp.float32), 0.0)


def _gat_layer_linear_kernel(mask_ref, src_ref, dstfill_ref, wh_ref,
                             wlt_ref, b_ref, out_ref):
    att = _attention_rows(mask_ref[...], src_ref[...],
                          dstfill_ref[0:1, :], dstfill_ref[1:2, :])
    h = jnp.maximum(
        jnp.dot(att, wh_ref[...], preferred_element_type=jnp.float32), 0.0)
    # Final nn.Linear fused into the last layer: y = h @ Wl^T + b (lane-dense).
    out_ref[...] = (jnp.dot(h, wlt_ref[...], preferred_element_type=jnp.float32)
                    + b_ref[...])


def _attention_layer(mask, src, dstfill, wh, wlt=None, b=None, *, tq):
    """One GAT layer (optionally + final linear) as a row-tiled pallas_call."""
    np_, f = wh.shape
    n_tiles = np_ // tq
    in_specs = [
        pl.BlockSpec((tq, np_), lambda i: (i, 0)),   # mask: streamed row tiles
        pl.BlockSpec((tq, 1),   lambda i: (i, 0)),   # src scores: streamed
        pl.BlockSpec((2, np_),  lambda i: (0, 0)),   # dst scores + pad fill: resident
        pl.BlockSpec((np_, f),  lambda i: (0, 0)),   # Wh: resident across the grid
    ]
    operands = [mask, src, dstfill, wh]
    kernel = _gat_layer_kernel
    if wlt is not None:
        in_specs += [pl.BlockSpec((f, f), lambda i: (0, 0)),
                     pl.BlockSpec((1, f), lambda i: (0, 0))]
        operands += [wlt, b]
        kernel = _gat_layer_linear_kernel
    return pl.pallas_call(
        kernel,
        out_shape=jax.ShapeDtypeStruct((np_, f), jnp.float32),
        grid=(n_tiles,),
        in_specs=in_specs,
        out_specs=pl.BlockSpec((tq, f), lambda i: (i, 0)),
        compiler_params=pltpu.CompilerParams(
            dimension_semantics=("parallel",),          # shards row tiles on v7x
            vmem_limit_bytes=_vmem_limit_bytes(tq, np_, f)),
    )(*operands)


# ------------------------------ JAX wrapper -----------------------------------

def gat_forward(params, adj, x):
    n, in_f = x.shape
    n_layers = len(params["gat"])
    wl, bl = params["linear"]
    out_f = wl.shape[0]

    tq, np_ = _pick_tiles(n)
    f = F_PAD

    # Zero-pad nodes to Np and features to 128 lanes (exact zeros -> same math,
    # lane-dense loads/stores and full MXU columns).
    h = jnp.zeros((np_, f), jnp.float32).at[:n, :in_f].set(x.astype(jnp.float32))
    # bf16 0/1 mask: only the ">0" predicate is ever used; halves adj traffic.
    mask = jnp.zeros((np_, np_), jnp.bfloat16).at[:n, :n].set(
        (adj > 0).astype(jnp.bfloat16))
    # Fill value per key column when mask == 0 (see _attention_rows).
    fill = jnp.where(jnp.arange(np_) < n, 0.0, _PAD_FILL).astype(jnp.float32)

    wlt_p = jnp.zeros((f, f), jnp.float32).at[:out_f, :out_f].set(wl.T)
    b_p = jnp.zeros((1, f), jnp.float32).at[0, :out_f].set(bl)

    for li, (w, w2) in enumerate(params["gat"]):
        fi, fo = w.shape
        w_p = jnp.zeros((f, f), jnp.float32).at[:fi, :fo].set(w)
        # Both attention projections fused into one (F, 2) matrix:
        # column 0 = source projection, column 1 = destination projection.
        a_p = (jnp.zeros((f, 2), jnp.float32)
               .at[:fo, 0].set(w2[:fo, 0])
               .at[:fo, 1].set(w2[fo:, 0]))
        # O(N*F) per-node work: computed once per layer (negligible vs O(N^2))
        # and then held resident in VMEM across the whole row-tiled grid.
        wh = h @ w_p                     # (Np, F)
        proj = wh @ a_p                  # (Np, 2): col0 = src, col1 = dst
        src = proj[:, 0:1]               # (Np, 1)
        dstfill = jnp.stack([proj[:, 1], fill], axis=0)     # (2, Np)
        if li == n_layers - 1:
            h = _attention_layer(mask, src, dstfill, wh, wlt_p, b_p, tq=tq)
        else:
            h = _attention_layer(mask, src, dstfill, wh, tq=tq)

    return h[:n, :out_f]


# ------------------------- parameter construction -----------------------------

def xavier_uniform(key, shape):
    fan_in, fan_out = shape[0], shape[1]
    bound = jnp.sqrt(6.0 / (fan_in + fan_out))
    return jax.random.uniform(key, shape, jnp.float32, -bound, bound)


def init_gat_network(key, in_feats=36, out_feats=2, n_layers=2, n_hidden=2):
    all_in = [in_feats] + [n_hidden] * (n_layers - 1)
    all_out = [n_hidden] * (n_layers - 1) + [out_feats]
    params = {"gat": [], "linear": None}
    for fi, fo in zip(all_in, all_out):
        key, k1, k2 = jax.random.split(key, 3)
        W = xavier_uniform(k1, (fi, fo))
        W2 = xavier_uniform(k2, (2 * fo, 1))
        params["gat"].append((W, W2))
    key, kw, kb = jax.random.split(key, 3)
    bound = 1.0 / jnp.sqrt(out_feats)      # nn.Linear default init
    Wl = jax.random.uniform(kw, (out_feats, out_feats), jnp.float32, -bound, bound)
    bl = jax.random.uniform(kb, (out_feats,), jnp.float32, -bound, bound)
    params["linear"] = (Wl, bl)
    return params


# ------------------------------- reference ------------------------------------

def gat_forward_ref(params, adj, x):
    h = x
    for (W, W2) in params["gat"]:
        out_f = W.shape[1]
        wh = h @ W
        wh1 = wh @ W2[:out_f]
        wh2 = wh @ W2[out_f:]
        e = wh1 + wh2.T
        e = jnp.where(e >= 0, e, 0.2 * e)
        att = jnp.where(adj > 0, e, jnp.zeros_like(e))
        att = jax.nn.softmax(att, axis=1)
        h = jnp.maximum(att @ wh, 0.0)
    Wl, bl = params["linear"]
    return h @ Wl.T + bl


# --------------------------------- main ----------------------------------------

if __name__ == "__main__":
    key = jax.random.PRNGKey(0)
    N = 8                # number of graph nodes
    in_feats = 36
    out_feats = 2
    n_layers = 2
    n_hidden = 2

    key, k_adj, k_x, k_p = jax.random.split(key, 4)
    # deterministic binary adjacency with self loops
    adj = (jax.random.uniform(k_adj, (N, N)) > 0.5).astype(jnp.float32)
    adj = jnp.maximum(adj, jnp.eye(N, dtype=jnp.float32))
    x = jax.random.normal(k_x, (N, in_feats), jnp.float32)

    params = init_gat_network(k_p, in_feats, out_feats, n_layers, n_hidden)

    fwd = jax.jit(gat_forward)
    out = jax.block_until_ready(fwd(params, adj, x))

    ref = gat_forward_ref(params, adj, x)
    assert out.shape == (N, out_feats)
    assert jnp.allclose(out, ref, rtol=2e-4, atol=2e-4), (out, ref)

    print("KERNEL_OK")
</pallas_src>

<mosaic_0001>
module attributes {stable_mosaic.version = 11 : i64} {
  func.func @_gat_layer_kernel(%arg0: i32, %arg1: memref<8x8xbf16, #tpu.memory_space<vmem>>, %arg2: memref<8x1xf32, #tpu.memory_space<vmem>>, %arg3: memref<2x8xf32, #tpu.memory_space<vmem>>, %arg4: memref<8x128xf32, #tpu.memory_space<vmem>>, %arg5: memref<8x128xf32, #tpu.memory_space<vmem>>) attributes {dimension_semantics = [#tpu.dimension_semantics<parallel>], iteration_bounds = array<i64: 1>, scalar_prefetch = 0 : i64, scratch_operands = 0 : i64, tpu.core_type = #tpu.core_type<tc>, window_params = [{transform_indices = @transform_0, window_bounds = array<i64: 8, 8>}, {transform_indices = @transform_1, window_bounds = array<i64: 8, 1>}, {pipeline_mode = #tpu.pipeline_mode<synchronous>, transform_indices = @transform_2, window_bounds = array<i64: 2, 8>}, {pipeline_mode = #tpu.pipeline_mode<synchronous>, transform_indices = @transform_3, window_bounds = array<i64: 8, 128>}, {transform_indices = @transform_4, window_bounds = array<i64: 8, 128>}]} {
    %c0 = arith.constant 0 : index
    %c0_0 = arith.constant 0 : index
    %0 = vector.load %arg1[%c0, %c0_0] : memref<8x8xbf16, #tpu.memory_space<vmem>>, vector<8x8xbf16>
    %c0_1 = arith.constant 0 : index
    %c0_2 = arith.constant 0 : index
    %1 = vector.load %arg2[%c0_1, %c0_2] : memref<8x1xf32, #tpu.memory_space<vmem>>, vector<8x1xf32>
    %c0_3 = arith.constant 0 : index
    %c0_4 = arith.constant 0 : index
    %2 = vector.load %arg3[%c0_3, %c0_4] : memref<2x8xf32, #tpu.memory_space<vmem>>, vector<1x8xf32>
    %c1 = arith.constant 1 : index
    %c0_5 = arith.constant 0 : index
    %3 = vector.load %arg3[%c1, %c0_5] : memref<2x8xf32, #tpu.memory_space<vmem>>, vector<1x8xf32>
    %4 = vector.broadcast %1 : vector<8x1xf32> to vector<8x8xf32>
    %5 = vector.broadcast %2 : vector<1x8xf32> to vector<8x8xf32>
    %6 = arith.addf %4, %5 : vector<8x8xf32>
    %cst = arith.constant 0.000000e+00 : bf16
    %7 = vector.broadcast %cst : bf16 to vector<8x8xbf16>
    %8 = arith.cmpf ogt, %0, %7 : vector<8x8xbf16>
    %cst_6 = arith.constant 0.000000e+00 : f32
    %9 = vector.broadcast %cst_6 : f32 to vector<8x8xf32>
    %10 = arith.cmpf oge, %6, %9 : vector<8x8xf32>
    %cst_7 = arith.constant 2.000000e-01 : f32
    %11 = vector.broadcast %cst_7 : f32 to vector<8x8xf32>
    %12 = arith.mulf %11, %6 : vector<8x8xf32>
    %13 = arith.select %10, %6, %12 : vector<8x8xi1>, vector<8x8xf32>
    %14 = vector.shape_cast %3 : vector<1x8xf32> to vector<1x8xf32>
    %15 = vector.broadcast %14 : vector<1x8xf32> to vector<8x8xf32>
    %16 = arith.select %8, %13, %15 : vector<8x8xi1>, vector<8x8xf32>
    %cst_8 = arith.constant dense<0xFF800000> : vector<8xf32>
    %17 = vector.multi_reduction <maximumf>, %16, %cst_8 [1] : vector<8x8xf32> to vector<8xf32>
    %18 = vector.shape_cast %17 : vector<8xf32> to vector<8x1xf32>
    %19 = vector.broadcast %18 : vector<8x1xf32> to vector<8x8xf32>
    %20 = arith.subf %16, %19 : vector<8x8xf32>
    %21 = math.exp %20 : vector<8x8xf32>
    %cst_9 = arith.constant dense<0.000000e+00> : vector<8xf32>
    %22 = vector.multi_reduction <add>, %21, %cst_9 [1] : vector<8x8xf32> to vector<8xf32>
    %23 = vector.shape_cast %22 : vector<8xf32> to vector<8x1xf32>
    %24 = tpu.reciprocal %23 {approx = true} : vector<8x1xf32> -> vector<8x1xf32>
    %25 = arith.mulf %23, %24 : vector<8x1xf32>
    %cst_10 = arith.constant 2.000000e+00 : f32
    %26 = vector.broadcast %cst_10 : f32 to vector<8x1xf32>
    %27 = arith.subf %26, %25 : vector<8x1xf32>
    %28 = arith.mulf %24, %27 : vector<8x1xf32>
    %29 = vector.broadcast %28 : vector<8x1xf32> to vector<8x8xf32>
    %30 = arith.mulf %21, %29 : vector<8x8xf32>
    %c0_11 = arith.constant 0 : index
    %c0_12 = arith.constant 0 : index
    %31 = vector.load %arg4[%c0_11, %c0_12] : memref<8x128xf32, #tpu.memory_space<vmem>>, vector<8x128xf32>
    %cst_13 = arith.constant dense<0.000000e+00> : vector<8x128xf32>
    %32 = tpu.matmul %30, %31, %cst_13 {dimension_numbers = #tpu.dot_dimension_numbers<[1], [0], [0], [1], [0, 0, 1, 1], [], []>} : vector<8x8xf32>, vector<8x128xf32>, vector<8x128xf32> -> vector<8x128xf32>
    %cst_14 = arith.constant 0.000000e+00 : f32
    %33 = vector.broadcast %cst_14 : f32 to vector<8x128xf32>
    %34 = arith.maximumf %32, %33 : vector<8x128xf32>
    %c0_15 = arith.constant 0 : index
    %c0_16 = arith.constant 0 : index
    %35 = vector.load %arg5[%c0_15, %c0_16] : memref<8x128xf32, #tpu.memory_space<vmem>>, vector<8x128xf32>
    tpu.vector_store %arg5[%c0_15, %c0_16], %34 {strides = array<i32>} : memref<8x128xf32, #tpu.memory_space<vmem>>, vector<8x128xf32>,
    return
  }
  func.func @transform_0(%arg0: i32) -> (i32, i32) {
    %c0_i32 = arith.constant 0 : i32
    %c0_i32_0 = arith.constant 0 : i32
    return %arg0, %c0_i32 : i32, i32
  }
  func.func @transform_1(%arg0: i32) -> (i32, i32) {
    %c0_i32 = arith.constant 0 : i32
    %c0_i32_0 = arith.constant 0 : i32
    return %arg0, %c0_i32 : i32, i32
  }
  func.func @transform_2(%arg0: i32) -> (i32, i32) {
    %c0_i32 = arith.constant 0 : i32
    %c0_i32_0 = arith.constant 0 : i32
    %c0_i32_1 = arith.constant 0 : i32
    return %c0_i32, %c0_i32_0 : i32, i32
  }
  func.func @transform_3(%arg0: i32) -> (i32, i32) {
    %c0_i32 = arith.constant 0 : i32
    %c0_i32_0 = arith.constant 0 : i32
    %c0_i32_1 = arith.constant 0 : i32
    return %c0_i32, %c0_i32_0 : i32, i32
  }
  func.func @transform_4(%arg0: i32) -> (i32, i32) {
    %c0_i32 = arith.constant 0 : i32
    %c0_i32_0 = arith.constant 0 : i32
    return %arg0, %c0_i32 : i32, i32
  }
}

module attributes {stable_mosaic.version = 11 : i64} {
  func.func @_gat_layer_linear_kernel(%arg0: i32, %arg1: memref<8x8xbf16, #tpu.memory_space<vmem>>, %arg2: memref<8x1xf32, #tpu.memory_space<vmem>>, %arg3: memref<2x8xf32, #tpu.memory_space<vmem>>, %arg4: memref<8x128xf32, #tpu.memory_space<vmem>>, %arg5: memref<128x128xf32, #tpu.memory_space<vmem>>, %arg6: memref<1x128xf32, #tpu.memory_space<vmem>>, %arg7: memref<8x128xf32, #tpu.memory_space<vmem>>) attributes {dimension_semantics = [#tpu.dimension_semantics<parallel>], iteration_bounds = array<i64: 1>, scalar_prefetch = 0 : i64, scratch_operands = 0 : i64, tpu.core_type = #tpu.core_type<tc>, window_params = [{transform_indices = @transform_0, window_bounds = array<i64: 8, 8>}, {transform_indices = @transform_1, window_bounds = array<i64: 8, 1>}, {pipeline_mode = #tpu.pipeline_mode<synchronous>, transform_indices = @transform_2, window_bounds = array<i64: 2, 8>}, {pipeline_mode = #tpu.pipeline_mode<synchronous>, transform_indices = @transform_3, window_bounds = array<i64: 8, 128>}, {pipeline_mode = #tpu.pipeline_mode<synchronous>, transform_indices = @transform_4, window_bounds = array<i64: 128, 128>}, {pipeline_mode = #tpu.pipeline_mode<synchronous>, transform_indices = @transform_5, window_bounds = array<i64: 1, 128>}, {transform_indices = @transform_6, window_bounds = array<i64: 8, 128>}]} {
    %c0 = arith.constant 0 : index
    %c0_0 = arith.constant 0 : index
    %0 = vector.load %arg1[%c0, %c0_0] : memref<8x8xbf16, #tpu.memory_space<vmem>>, vector<8x8xbf16>
    %c0_1 = arith.constant 0 : index
    %c0_2 = arith.constant 0 : index
    %1 = vector.load %arg2[%c0_1, %c0_2] : memref<8x1xf32, #tpu.memory_space<vmem>>, vector<8x1xf32>
    %c0_3 = arith.constant 0 : index
    %c0_4 = arith.constant 0 : index
    %2 = vector.load %arg3[%c0_3, %c0_4] : memref<2x8xf32, #tpu.memory_space<vmem>>, vector<1x8xf32>
    %c1 = arith.constant 1 : index
    %c0_5 = arith.constant 0 : index
    %3 = vector.load %arg3[%c1, %c0_5] : memref<2x8xf32, #tpu.memory_space<vmem>>, vector<1x8xf32>
    %4 = vector.broadcast %1 : vector<8x1xf32> to vector<8x8xf32>
    %5 = vector.broadcast %2 : vector<1x8xf32> to vector<8x8xf32>
    %6 = arith.addf %4, %5 : vector<8x8xf32>
    %cst = arith.constant 0.000000e+00 : bf16
    %7 = vector.broadcast %cst : bf16 to vector<8x8xbf16>
    %8 = arith.cmpf ogt, %0, %7 : vector<8x8xbf16>
    %cst_6 = arith.constant 0.000000e+00 : f32
    %9 = vector.broadcast %cst_6 : f32 to vector<8x8xf32>
    %10 = arith.cmpf oge, %6, %9 : vector<8x8xf32>
    %cst_7 = arith.constant 2.000000e-01 : f32
    %11 = vector.broadcast %cst_7 : f32 to vector<8x8xf32>
    %12 = arith.mulf %11, %6 : vector<8x8xf32>
    %13 = arith.select %10, %6, %12 : vector<8x8xi1>, vector<8x8xf32>
    %14 = vector.shape_cast %3 : vector<1x8xf32> to vector<1x8xf32>
    %15 = vector.broadcast %14 : vector<1x8xf32> to vector<8x8xf32>
    %16 = arith.select %8, %13, %15 : vector<8x8xi1>, vector<8x8xf32>
    %cst_8 = arith.constant dense<0xFF800000> : vector<8xf32>
    %17 = vector.multi_reduction <maximumf>, %16, %cst_8 [1] : vector<8x8xf32> to vector<8xf32>
    %18 = vector.shape_cast %17 : vector<8xf32> to vector<8x1xf32>
    %19 = vector.broadcast %18 : vector<8x1xf32> to vector<8x8xf32>
    %20 = arith.subf %16, %19 : vector<8x8xf32>
    %21 = math.exp %20 : vector<8x8xf32>
    %cst_9 = arith.constant dense<0.000000e+00> : vector<8xf32>
    %22 = vector.multi_reduction <add>, %21, %cst_9 [1] : vector<8x8xf32> to vector<8xf32>
    %23 = vector.shape_cast %22 : vector<8xf32> to vector<8x1xf32>
    %24 = tpu.reciprocal %23 {approx = true} : vector<8x1xf32> -> vector<8x1xf32>
    %25 = arith.mulf %23, %24 : vector<8x1xf32>
    %cst_10 = arith.constant 2.000000e+00 : f32
    %26 = vector.broadcast %cst_10 : f32 to vector<8x1xf32>
    %27 = arith.subf %26, %25 : vector<8x1xf32>
    %28 = arith.mulf %24, %27 : vector<8x1xf32>
    %29 = vector.broadcast %28 : vector<8x1xf32> to vector<8x8xf32>
    %30 = arith.mulf %21, %29 : vector<8x8xf32>
    %c0_11 = arith.constant 0 : index
    %c0_12 = arith.constant 0 : index
    %31 = vector.load %arg4[%c0_11, %c0_12] : memref<8x128xf32, #tpu.memory_space<vmem>>, vector<8x128xf32>
    %cst_13 = arith.constant dense<0.000000e+00> : vector<8x128xf32>
    %32 = tpu.matmul %30, %31, %cst_13 {dimension_numbers = #tpu.dot_dimension_numbers<[1], [0], [0], [1], [0, 0, 1, 1], [], []>} : vector<8x8xf32>, vector<8x128xf32>, vector<8x128xf32> -> vector<8x128xf32>
    %cst_14 = arith.constant 0.000000e+00 : f32
    %33 = vector.broadcast %cst_14 : f32 to vector<8x128xf32>
    %34 = arith.maximumf %32, %33 : vector<8x128xf32>
    %c0_15 = arith.constant 0 : index
    %c0_16 = arith.constant 0 : index
    %35 = vector.load %arg5[%c0_15, %c0_16] : memref<128x128xf32, #tpu.memory_space<vmem>>, vector<128x128xf32>
    %cst_17 = arith.constant dense<0.000000e+00> : vector<8x128xf32>
    %36 = tpu.matmul %34, %35, %cst_17 {dimension_numbers = #tpu.dot_dimension_numbers<[1], [0], [0], [1], [0, 0, 1, 1], [], []>} : vector<8x128xf32>, vector<128x128xf32>, vector<8x128xf32> -> vector<8x128xf32>
    %c0_18 = arith.constant 0 : index
    %c0_19 = arith.constant 0 : index
    %37 = vector.load %arg6[%c0_18, %c0_19] : memref<1x128xf32, #tpu.memory_space<vmem>>, vector<1x128xf32>
    %38 = vector.broadcast %37 : vector<1x128xf32> to vector<8x128xf32>
    %39 = arith.addf %36, %38 : vector<8x128xf32>
    %c0_20 = arith.constant 0 : index
    %c0_21 = arith.constant 0 : index
    %40 = vector.load %arg7[%c0_20, %c0_21] : memref<8x128xf32, #tpu.memory_space<vmem>>, vector<8x128xf32>
    tpu.vector_store %arg7[%c0_20, %c0_21], %39 {strides = array<i32>} : memref<8x128xf32, #tpu.memory_space<vmem>>, vector<8x128xf32>,
    return
  }
  func.func @transform_0(%arg0: i32) -> (i32, i32) {
    %c0_i32 = arith.constant 0 : i32
    %c0_i32_0 = arith.constant 0 : i32
    return %arg0, %c0_i32 : i32, i32
  }
  func.func @transform_1(%arg0: i32) -> (i32, i32) {
    %c0_i32 = arith.constant 0 : i32
    %c0_i32_0 = arith.constant 0 : i32
    return %arg0, %c0_i32 : i32, i32
  }
  func.func @transform_2(%arg0: i32) -> (i32, i32) {
    %c0_i32 = arith.constant 0 : i32
    %c0_i32_0 = arith.constant 0 : i32
    %c0_i32_1 = arith.constant 0 : i32
    return %c0_i32, %c0_i32_0 : i32, i32
  }
  func.func @transform_3(%arg0: i32) -> (i32, i32) {
    %c0_i32 = arith.constant 0 : i32
    %c0_i32_0 = arith.constant 0 : i32
    %c0_i32_1 = arith.constant 0 : i32
    return %c0_i32, %c0_i32_0 : i32, i32
  }
  func.func @transform_4(%arg0: i32) -> (i32, i32) {
    %c0_i32 = arith.constant 0 : i32
    %c0_i32_0 = arith.constant 0 : i32
    %c0_i32_1 = arith.constant 0 : i32
    return %c0_i32, %c0_i32_0 : i32, i32
  }
  func.func @transform_5(%arg0: i32) -> (i32, i32) {
    %c0_i32 = arith.constant 0 : i32
    %c0_i32_0 = arith.constant 0 : i32
    %c0_i32_1 = arith.constant 0 : i32
    return %c0_i32, %c0_i32_0 : i32, i32
  }
  func.func @transform_6(%arg0: i32) -> (i32, i32) {
    %c0_i32 = arith.constant 0 : i32
    %c0_i32_0 = arith.constant 0 : i32
    return %arg0, %c0_i32 : i32, i32
  }
}

</mosaic_0001>

<bundles_post_ra>
// kernel: gat_forward.2
= control target key start
LH: loop header
LB: loop body
LE: loop exit
PB: predicated region body
PF: predicated region fallthrough
CT: control target
= control target key end

     0   :  { %v159_v0 = vmov 0   ;;  %vm46_vm3 = vcmask 64512   ;;  %v160_v18 = vmov 0.0   ;;  %vm161_vm4 = vmmov 0   ;;  %s208_s1 = inlined_call_operand.vmem [shape: f32[8,1], index: 1, kind: input, shape index: {}]   ;;  %s209_s0 = inlined_call_operand.vmem [shape: bf16[8,8], index: 0, kind: input, shape index: {}]   ;;  %s210_s2 = inlined_call_operand.vmem [shape: f32[2,8], index: 2, kind: input, shape index: {}]   ;;  %s211_s3 = inlined_call_operand.vmem [shape: f32[8,128], index: 3, kind: input, shape index: {}]   ;;  %s212_s4 = inlined_call_operand.vmem [shape: f32[8,128], index: 4, kind: output, shape index: {}]  }
   0x1   :  { %154 = vset.pattern.permute.xlu0 %v159_v0  ;;  %v21_v1 = vld [vmem:[%s208_s1] sm:$0xff]  ;;  %146 = vmatprep.subr.mxu0 %v160_v18 }
   0x2   :  { %26 = vperm.xlu0 %154, %v21_v1   ;;  %v20_v2 = vld [vmem:[%s209_s0] sm:$0xf]  ;;  %148 = vmatprep.mubr.msk.f32.mxu0 %vm161_vm4, %v160_v18 }
   0x3   :  { %vm34_vm0 = vcmp.gt.bf16.partialorder %v20_v2, 0  ;;  %v141_v4 = vld [vmem:[%s210_s2] ss:$0 sm:$0xff]  ;;  %v142_v8 = vld [vmem:[%s210_s2 + $0x1] ss:$0 sm:$0xff] }
   0x4   :  { %v42_v3 = vsel %vm34_vm0, 65537, %v159_v0  ;;  %v61_v19 = vld [vmem:[%s211_s3] sm:$0xff] }
   0x5   :  { %v43_v5 = vunpack.c.l.b16 %v42_v3  ;;  %147 = vmatpush3.msra.mxu0 %v61_v19 }
   0x7   :  { %vm44_vm1 = vcmp.ne.s32.totalorder %v43_v5, 0 }
  0x81   :  { %v27_v6 = vpop.permute.xlu0 %26 }
  0x82   :  { %v33_v7 = vadd.f32 %v141_v4, %v27_v6 }
  0x84   :  { %vm35_vm2 = vcmp.ge.f32.partialorder %v33_v7, 0.0  ;;  %v36_v9 = vmul.f32 0.2, %v33_v7 }
  0x86   :  { %v37_v10 = vsel %vm35_vm2, %v33_v7, %v36_v9 }
  0x87   :  { %v45_v11 = vsel %vm44_vm1, %v37_v10, %v142_v8 }
  0x88   :  { %v47_v12 = vsel %vm46_vm3, %v45_v11, -inf }
  0x89   :  { %48 = vmax.xlane.f32.xlu0 %v47_v12 }
 0x116   :  { %v49_v13 = vpop.xlane.xlu0 %48 }
 0x117   :  { %v50_v14 = vsub.f32 %v45_v11, %v49_v13 }
 0x119   :  { %v51_v15 = vmul.f32 1.442695, %v50_v14 }
 0x11b   :  { %155 = vpow2.f32 %v51_v15 }
 0x125   :  { %v156_v16 = vpop.eup %155 }
 0x126   :  { %v53_v17 = vsel %vm46_vm3, %v156_v16, 0.0 }
 0x127   :  { %54 = vadd.xlane.f32.xlu1 %v53_v17 }
 0x1b4   :  { %v55_v20 = vpop.xlane.xlu1 %54 }
 0x1b5   :  { %157 = vrcp.f32 %v55_v20 }
 0x1bf   :  { %v158_v21 = vpop.eup %157 }
 0x1c0   :  { %v57_v22 = vmul.f32 %v158_v21, %v55_v20 }
 0x1c2   :  { %v58_v23 = vsub.f32 2.0, %v57_v22 }
 0x1c4   :  { %v59_v24 = vmul.f32 %v158_v21, %v58_v23 }
 0x1c6   :  { %v60_v25 = vmul.f32 %v156_v16, %v59_v24 }
 0x1c8   :  { %149 = vmatmul.mubr.msk.f32.vlgmr.msra.gmra.mrb[0].mxu0 %vm46_vm3, %v60_v25 }
 0x29b   :  { %v131_v26 = vpop.f32.mrb[0].mxu0 }
 0x29c   :  { %v135_v27 = vmax.f32 %v131_v26, 0.0  ;;  %v150_v28 = vpop.f32.mrb[1].mxu0 }
 0x29e   :  { %136 = vst [vmem:[%s212_s4] sm:$0xff] %v135_v27 }

// kernel: gat_forward.3
= control target key start
LH: loop header
LB: loop body
LE: loop exit
PB: predicated region body
PF: predicated region fallthrough
CT: control target
= control target key end

     0   :  { %v336_v0 = vmov 0   ;;  %vm52_vm3 = vcmask 64512   ;;  %v337_v18 = vmov 0.0   ;;  %vm338_vm4 = vmmov 0   ;;  %s447_s1 = inlined_call_operand.vmem [shape: f32[8,1], index: 1, kind: input, shape index: {}]   ;;  %s448_s0 = inlined_call_operand.vmem [shape: bf16[8,8], index: 0, kind: input, shape index: {}]   ;;  %s449_s2 = inlined_call_operand.vmem [shape: f32[2,8], index: 2, kind: input, shape index: {}]   ;;  %s450_s3 = inlined_call_operand.vmem [shape: f32[8,128], index: 3, kind: input, shape index: {}]   ;;  %s451_s4 = inlined_call_operand.vmem [shape: f32[128,128], index: 4, kind: input, shape index: {}]   ;;  %s452_s5 = inlined_call_operand.vmem [shape: f32[1,128], index: 5, kind: input, shape index: {}]   ;;  %s453_s6 = inlined_call_operand.vmem [shape: f32[8,128], index: 6, kind: output, shape index: {}]  }
   0x1   :  { %331 = vset.pattern.permute.xlu0 %v336_v0  ;;  %v27_v1 = vld [vmem:[%s447_s1] sm:$0xff]  ;;  %263 = vmatprep.subr.mxu0 %v337_v18  ;;  %v339_v20 = vmov 0.0|0.0   ;;  %v143_v22 = vld [vmem:[%s451_s4 + $0x8] sm:$0xff]  ;;  %v144_v23 = vld [vmem:[%s451_s4 + $0x10] sm:$0xff] }
   0x2   :  { %32 = vperm.xlu0 %331, %v27_v1   ;;  %v26_v2 = vld [vmem:[%s448_s0] sm:$0xf]  ;;  %265 = vmatprep.mubr.msk.f32.mxu0 %vm338_vm4, %v337_v18  ;;  %v145_v25 = vld [vmem:[%s451_s4 + $0x18] sm:$0xff]  ;;  %v147_v28 = vld [vmem:[%s451_s4 + $0x28] sm:$0xff] }
   0x3   :  { %vm40_vm0 = vcmp.gt.bf16.partialorder %v26_v2, 0  ;;  %v240_v4 = vld [vmem:[%s449_s2] ss:$0 sm:$0xff]  ;;  %v241_v8 = vld [vmem:[%s449_s2 + $0x1] ss:$0 sm:$0xff]  ;;  %300 = vmatprep.mubr.msk.f32.mxu1 %vm338_vm4, %v337_v18  ;;  %303 = vmatprep.subr.bf16.mxu1 %v339_v20  ;;  %v307_v26 = vpack.c.bf16 %v145_v25, %v144_v23  ;;  %v148_v30 = vld [vmem:[%s451_s4 + $0x30] sm:$0xff] }
   0x4   :  { %v48_v3 = vsel %vm40_vm0, 65537, %v336_v0  ;;  %v67_v19 = vld [vmem:[%s450_s3] sm:$0xff]  ;;  %v149_v31 = vld [vmem:[%s451_s4 + $0x38] sm:$0xff]  ;;  %v151_v34 = vld [vmem:[%s451_s4 + $0x48] sm:$0xff] }
   0x5   :  { %v49_v5 = vunpack.c.l.b16 %v48_v3  ;;  %264 = vmatpush3.msra.mxu0 %v67_v19  ;;  %v142_v21 = vld [vmem:[%s451_s4] sm:$0xff]  ;;  %v313_v32 = vpack.c.bf16 %v149_v31, %v148_v30  ;;  %v152_v36 = vld [vmem:[%s451_s4 + $0x50] sm:$0xff]  ;;  %v153_v37 = vld [vmem:[%s451_s4 + $0x58] sm:$0xff] }
   0x6   :  { %v304_v24 = vpack.c.bf16 %v143_v22, %v142_v21  ;;  %v146_v27 = vld [vmem:[%s451_s4 + $0x20] sm:$0xff]  ;;  %v319_v38 = vpack.c.bf16 %v153_v37, %v152_v36  ;;  %v155_v40 = vld [vmem:[%s451_s4 + $0x68] sm:$0xff]  ;;  %v156_v48 = vld [vmem:[%s451_s4 + $0x70] sm:$0xff] }
   0x7   :  { %vm50_vm1 = vcmp.ne.s32.totalorder %v49_v5, 0  ;;  %v310_v29 = vpack.c.bf16 %v147_v28, %v146_v27  ;;  %v150_v33 = vld [vmem:[%s451_s4 + $0x40] sm:$0xff]  ;;  %v157_v49 = vld [vmem:[%s451_s4 + $0x78] sm:$0xff] }
   0x8   :  { %305 = vmatpush3.bf16.msra.mxu1 %v304_v24  ;;  %v316_v35 = vpack.c.bf16 %v151_v34, %v150_v33  ;;  %v154_v39 = vld [vmem:[%s451_s4 + $0x60] sm:$0xff]  ;;  %v325_v50 = vpack.c.bf16 %v157_v49, %v156_v48 }
   0x9   :  { %306 = vmatprep.subr.bf16.mxu1 %v339_v20  ;;  %v322_v41 = vpack.c.bf16 %v155_v40, %v154_v39  ;;  %v243_v54 = vld [vmem:[%s452_s5] ss:$0 sm:$0xff] }
   0xc   :  { %308 = vmatpush3.bf16.msra.mxu1 %v307_v26 }
   0xd   :  { %309 = vmatprep.subr.bf16.mxu1 %v339_v20 }
  0x10   :  { %311 = vmatpush3.bf16.msra.mxu1 %v310_v29 }
  0x11   :  { %312 = vmatprep.subr.bf16.mxu1 %v339_v20 }
  0x14   :  { %314 = vmatpush3.bf16.msra.mxu1 %v313_v32 }
  0x15   :  { %315 = vmatprep.subr.bf16.mxu1 %v339_v20 }
  0x18   :  { %317 = vmatpush3.bf16.msra.mxu1 %v316_v35 }
  0x19   :  { %318 = vmatprep.subr.bf16.mxu1 %v339_v20 }
  0x1c   :  { %320 = vmatpush3.bf16.msra.mxu1 %v319_v38 }
  0x1d   :  { %321 = vmatprep.subr.bf16.mxu1 %v339_v20 }
  0x20   :  { %323 = vmatpush3.bf16.msra.mxu1 %v322_v41 }
  0x21   :  { %324 = vmatprep.subr.bf16.mxu1 %v339_v20 }
  0x24   :  { %326 = vmatpush3.bf16.msra.mxu1 %v325_v50 }
  0x81   :  { %v33_v6 = vpop.permute.xlu0 %32 }
  0x82   :  { %v39_v7 = vadd.f32 %v240_v4, %v33_v6 }
  0x84   :  { %vm41_vm2 = vcmp.ge.f32.partialorder %v39_v7, 0.0  ;;  %v42_v9 = vmul.f32 0.2, %v39_v7 }
  0x86   :  { %v43_v10 = vsel %vm41_vm2, %v39_v7, %v42_v9 }
  0x87   :  { %v51_v11 = vsel %vm50_vm1, %v43_v10, %v241_v8 }
  0x88   :  { %v53_v12 = vsel %vm52_vm3, %v51_v11, -inf }
  0x89   :  { %54 = vmax.xlane.f32.xlu0 %v53_v12 }
 0x116   :  { %v55_v13 = vpop.xlane.xlu0 %54 }
 0x117   :  { %v56_v14 = vsub.f32 %v51_v11, %v55_v13 }
 0x119   :  { %v57_v15 = vmul.f32 1.442695, %v56_v14 }
 0x11b   :  { %332 = vpow2.f32 %v57_v15 }
 0x125   :  { %v333_v16 = vpop.eup %332 }
 0x126   :  { %v59_v17 = vsel %vm52_vm3, %v333_v16, 0.0 }
 0x127   :  { %60 = vadd.xlane.f32.xlu1 %v59_v17 }
 0x1b4   :  { %v61_v42 = vpop.xlane.xlu1 %60 }
 0x1b5   :  { %334 = vrcp.f32 %v61_v42 }
 0x1bf   :  { %v335_v43 = vpop.eup %334 }
 0x1c0   :  { %v63_v44 = vmul.f32 %v335_v43, %v61_v42 }
 0x1c2   :  { %v64_v45 = vsub.f32 2.0, %v63_v44 }
 0x1c4   :  { %v65_v46 = vmul.f32 %v335_v43, %v64_v45 }
 0x1c6   :  { %v66_v47 = vmul.f32 %v333_v16, %v65_v46 }
 0x1c8   :  { %266 = vmatmul.mubr.msk.f32.vlgmr.msra.gmra.mrb[0].mxu0 %vm52_vm3, %v66_v47 }
 0x29b   :  { %v137_v51 = vpop.f32.mrb[0].mxu0 }
 0x29c   :  { %v141_v52 = vmax.f32 %v137_v51, 0.0  ;;  %v267_v53 = vpop.f32.mrb[1].mxu0 }
 0x29e   :  { %301 = vmatmul.mubr.f32.vlgmr.msra.gmra.mrb[0].mxu1 %v141_v52 }
 0x371   :  { %v231_v55 = vpop.f32.mrb[0].mxu1 }
 0x372   :  { %v232_v56 = vadd.f32 %v243_v54, %v231_v55  ;;  %v302_v57 = vpop.f32.mrb[1].mxu1 }
 0x374   :  { %235 = vst [vmem:[%s453_s6] sm:$0xff] %v232_v56 }

</bundles_post_ra>
